<compile_context>
chip_gen: v5e
topology: v5e:2x2
jax: 0.10.0
libtpu: 0.0.40
codegen_flags: <defaults>
</compile_context>

<pallas_src>
import numpy as np
import jax
import jax.numpy as jnp
from jax.experimental import pallas as pl
from jax.experimental.pallas import tpu as pltpu

BN_EPS = 1e-5
CONV_DTYPE = jnp.bfloat16            # dtype of the conv intermediate written to HBM
_VMEM_BUDGET = 22 * 1024 * 1024      # accounted per-step VMEM (headroom on v7x's 64 MiB)
_VMEM_LIMIT = 32 * 1024 * 1024       # explicit scoped-VMEM request (safe on v5e/v6e/v7x)


def _round_up(v, m):
    return -(-v // m) * m


def _phase1_tile(n_sub, c_in, c_out, f, k, t):
    """Largest lane-dense time tile whose TOTAL per-step VMEM footprint (double-buffered
    x + bf16 conv blocks, xsum/slab scratch, matmul operands/temporaries) fits the
    budget -- all users counted, not just the x block."""
    cap = max(128, _round_up(t, 128))

    def need(tt):
        w = n_sub * tt
        return (2 * n_sub * c_in * f * tt * 4          # x input block, double-buffered
                + 2 * n_sub * c_out * tt * 2           # bf16 conv output block, double-buffered
                + c_in * w * 4                          # xsum scratch
                + k * c_in * w * 4                      # slab scratch (f32)
                + k * c_in * w * 2                      # bf16 cast of the slab (matmul RHS)
                + 3 * c_out * w * 4                     # acc + masked/squared temporaries
                + 4 * c_out * k * c_in                  # weights (bf16 x 2 buffers)
                + 4 * 2 * n_sub * c_in * max(k // 2, 1) * 4)   # halo blocks

    for cand in (2048, 1536, 1024, 768, 512, 384, 256, 128):
        if cand <= cap and need(cand) <= _VMEM_BUDGET:
            return cand
    return 128


def _phase2_tile(n, c_out, t):
    cap = max(128, _round_up(t, 128))

    def need(tt):
        return 2 * n * c_out * tt * 2 + 2 * n * c_out * tt * 4 + n * c_out * tt * 4

    for cand in (8192, 4096, 2048, 1024, 512, 256, 128):
        if cand <= cap and need(cand) <= _VMEM_BUDGET:
            return cand
    return 128


def conv_h_forward(x, w, b, gamma, beta, *, tile_t=None, batch_splits=None):
    """x: (N, C_in, F, T) f32; w: (C_out, C_in, K); b/gamma/beta: (C_out,).
    Returns relu(batchnorm_train(conv1d(mean_over_F(x)))) as (N, C_out, T) f32."""
    x = jnp.asarray(x, jnp.float32)
    w = jnp.asarray(w, jnp.float32)
    b = jnp.asarray(b, jnp.float32)
    gamma = jnp.asarray(gamma, jnp.float32)
    beta = jnp.asarray(beta, jnp.float32)

    N, C_in, F, T = x.shape
    C_out, _, K = w.shape
    assert K % 2 == 1, "only odd filter_length keeps output length == T"
    # TODO(synk): even filter_length (PyTorch output length T+1) is not supported here.
    pad = K // 2
    Hp = max(pad, 1)
    KC = K * C_in

    # ---- grid geometry ----------------------------------------------------------------
    # Leading "parallel" batch-split axis: lets phase 1 run on both TensorCores on v7x
    # (per-split partial BN stats combined in the glue); harmless elsewhere.
    ns = batch_splits if batch_splits is not None else (2 if (N % 2 == 0 and N >= 2) else 1)
    assert N % ns == 0
    N_sub = N // ns
    TILE_T = _phase1_tile(N_sub, C_in, C_out, F, K, T) if tile_t is None else int(tile_t)
    assert TILE_T % 128 == 0, "time tile must be lane-dense (multiple of 128)"
    nt = -(-T // TILE_T)
    W = N_sub * TILE_T                         # lane width of the fused (batch, time) axis
    partial_last = (T % TILE_T) != 0
    last_valid = T - (nt - 1) * TILE_T         # static: valid columns in the last tile

    # ---- glue: weights as one (C_out, K*C_in) bf16 matrix; 1/F (freq average) folded in.
    # Row order = (tap k major, input channel minor), matching the slab build below.
    w2 = (jnp.transpose(w, (0, 2, 1)).reshape(C_out, KC) * (1.0 / F)).astype(jnp.bfloat16)

    # ---- glue: tiny halo side inputs = the freq-summed K//2 columns at every tile edge.
    # Only nt*2*pad columns of x are gathered; x itself is never padded/copied in HBM.
    tiles = np.arange(nt)
    taps = np.arange(Hp)
    li = tiles[:, None] * TILE_T - pad + taps[None, :]        # cols [i*TT - pad, i*TT)
    ri = (tiles[:, None] + 1) * TILE_T + taps[None, :]        # cols [(i+1)*TT, (i+1)*TT + pad)

    def _halo(idx):
        valid = (idx >= 0) & (idx < T)
        g = jnp.sum(x[:, :, :, np.clip(idx, 0, T - 1).reshape(-1)], axis=2)   # (N, C_in, nt*Hp)
        g = g.reshape(N, C_in, nt, Hp) * jnp.asarray(valid, jnp.float32)[None, None]
        return jnp.transpose(g, (2, 0, 1, 3))                                 # (nt, N, C_in, Hp)

    left_halo, right_halo = _halo(li), _halo(ri)

    # -------- phase 1: freq-reduce + K-tap conv (ONE MXU matmul) + BN statistics --------
    def phase1_kernel(x_ref, lh_ref, rh_ref, w_ref, conv_ref, sum_ref, ssq_ref,
                      xsum_ref, slab_ref):
        i = pl.program_id(1)

        # AvgPool2d((F,1)) == freq sum (the 1/F lives in w2), written straight into the
        # lane-packed (C_in, N_sub*TILE_T) layout so the batch rides the lane axis.
        for n in range(N_sub):
            xsum_ref[:, n * TILE_T:(n + 1) * TILE_T] = jnp.sum(x_ref[n], axis=1)

        # Zero the undefined OOB tail of the (only possibly partial) last tile.
        # Interior tiles skip the iota/select entirely.
        if partial_last:
            @pl.when(i == nt - 1)
            def _mask_tail():
                t_seg = jax.lax.broadcasted_iota(jnp.int32, (1, W), 1) % TILE_T
                xsum_ref[...] = jnp.where(t_seg < last_valid, xsum_ref[...], 0.0)

        # Build the (K*C_in, N_sub*TILE_T) tap slab: XLU rolls for the K shifts, then
        # patch the <= pad boundary lanes of every batch segment from the halo refs
        # (tiny aligned-start stores; no unaligned concat/slice copies).
        xs = xsum_ref[...]
        for k in range(K):
            shift = (pad - k) % W
            rolled = pltpu.roll(xs, shift, axis=1) if shift else xs
            slab_ref[k * C_in:(k + 1) * C_in, :] = rolled
        if pad > 0:
            for k in range(K):
                d = pad - k
                if d > 0:                              # left edge of every batch segment
                    for n in range(N_sub):
                        slab_ref[k * C_in:(k + 1) * C_in,
                                 n * TILE_T:n * TILE_T + d] = lh_ref[n, :, k:pad]
                e = k - pad
                if e > 0:                              # right edge of every batch segment
                    for n in range(N_sub):
                        slab_ref[k * C_in:(k + 1) * C_in,
                                 (n + 1) * TILE_T - e:(n + 1) * TILE_T] = rh_ref[n, :, :e]

        # ONE bf16 MXU matmul per tile: (C_out, K*C_in) x (K*C_in, N_sub*TILE_T), f32 acc.
        acc = jnp.dot(w_ref[...], slab_ref[...].astype(jnp.bfloat16),
                      preferred_element_type=jnp.float32)          # (C_out, N_sub*TILE_T)

        # bf16 conv intermediate (halves HBM writeback + phase-2 re-read); the per-batch
        # slices are lane-aligned (multiples of TILE_T, itself a multiple of 128).
        for n in range(N_sub):
            conv_ref[n] = acc[:, n * TILE_T:(n + 1) * TILE_T].astype(CONV_DTYPE)

        # BN statistics into resident (C_out, 1) accumulators; taken from the f32 acc.
        # TODO(synk): single-pass E[x^2]-E[x]^2 in f32 -- switch to a centered/Welford
        # combine if a channel's |mean| ever dwarfs its std.
        @pl.when(i == 0)
        def _init():
            sum_ref[...] = jnp.zeros_like(sum_ref)
            ssq_ref[...] = jnp.zeros_like(ssq_ref)

        def _accum(v):
            sum_ref[...] += jnp.sum(v, axis=1, keepdims=True)
            ssq_ref[...] += jnp.sum(v * v, axis=1, keepdims=True)

        if partial_last:
            @pl.when(i != nt - 1)
            def _interior():
                _accum(acc)

            @pl.when(i == nt - 1)
            def _edge():
                t_seg = jax.lax.broadcasted_iota(jnp.int32, (1, W), 1) % TILE_T
                _accum(jnp.where(t_seg < last_valid, acc, 0.0))
        else:
            _accum(acc)

    p1_flops = 2 * N * C_out * KC * T + N * C_in * F * T
    p1_bytes = (N * C_in * F * T * 4 + N * C_out * T * 2
                + 2 * nt * N * C_in * Hp * 4 + C_out * KC * 2 + 2 * ns * C_out * 4)

    conv, s1, s2 = pl.pallas_call(
        phase1_kernel,
        grid=(ns, nt),
        in_specs=[
            pl.BlockSpec((N_sub, C_in, F, TILE_T), lambda j, i: (j, 0, 0, i)),
            pl.BlockSpec((None, N_sub, C_in, Hp), lambda j, i: (i, j, 0, 0)),
            pl.BlockSpec((None, N_sub, C_in, Hp), lambda j, i: (i, j, 0, 0)),
            pl.BlockSpec((C_out, KC), lambda j, i: (0, 0)),
        ],
        out_specs=(
            pl.BlockSpec((N_sub, C_out, TILE_T), lambda j, i: (j, 0, i)),
            pl.BlockSpec((None, C_out, 1), lambda j, i: (j, 0, 0)),
            pl.BlockSpec((None, C_out, 1), lambda j, i: (j, 0, 0)),
        ),
        out_shape=(
            jax.ShapeDtypeStruct((N, C_out, T), CONV_DTYPE),
            jax.ShapeDtypeStruct((ns, C_out, 1), jnp.float32),
            jax.ShapeDtypeStruct((ns, C_out, 1), jnp.float32),
        ),
        scratch_shapes=[
            pltpu.VMEM((C_in, W), jnp.float32),        # freq-summed tile, lane-packed
            pltpu.VMEM((KC, W), jnp.float32),          # K-tap slab (matmul RHS)
        ],
        # Batch split is "parallel" (v7x dual-TensorCore); the time axis carries the
        # resident BN-stat accumulators -> "arbitrary".
        compiler_params=pltpu.CompilerParams(
            dimension_semantics=("parallel", "arbitrary"),
            vmem_limit_bytes=_VMEM_LIMIT),
        cost_estimate=pl.CostEstimate(flops=int(p1_flops), transcendentals=0,
                                      bytes_accessed=int(p1_bytes)),
    )(x, left_halo, right_halo, w2)

    # ---- glue: fold BatchNorm (train-mode, biased variance) + conv bias into a single
    # per-channel scale/shift (tiny C_out-length math).  The conv bias cancels exactly:
    # (conv + b) - mean(conv + b) == conv - mean(conv).
    cnt = jnp.float32(N * T)
    s1_tot = jnp.sum(s1[:, :, 0], axis=0)                      # (C_out,) sum of bias-free conv
    s2_tot = jnp.sum(s2[:, :, 0], axis=0)
    mean_nb = s1_tot / cnt
    var_nb = jnp.maximum(s2_tot / cnt - mean_nb * mean_nb, 0.0)
    scale = gamma * jax.lax.rsqrt(var_nb + BN_EPS)
    shift = beta - mean_nb * scale
    scale3 = scale.reshape(1, C_out, 1).astype(jnp.float32)
    shift3 = shift.reshape(1, C_out, 1).astype(jnp.float32)

    # -------- phase 2: y = conv * scale + shift, ReLU (one elementwise streaming pass) --
    TILE2 = _phase2_tile(N, C_out, T)
    nt2 = -(-T // TILE2)

    def phase2_kernel(conv_ref, scale_ref, shift_ref, o_ref):
        v = conv_ref[...].astype(jnp.float32)
        o_ref[...] = jnp.maximum(v * scale_ref[...] + shift_ref[...], 0.0)

    out = pl.pallas_call(
        phase2_kernel,
        grid=(nt2,),
        in_specs=[
            pl.BlockSpec((N, C_out, TILE2), lambda i: (0, 0, i)),
            pl.BlockSpec((1, C_out, 1), lambda i: (0, 0, 0)),
            pl.BlockSpec((1, C_out, 1), lambda i: (0, 0, 0)),
        ],
        out_specs=pl.BlockSpec((N, C_out, TILE2), lambda i: (0, 0, i)),
        out_shape=jax.ShapeDtypeStruct((N, C_out, T), jnp.float32),
        compiler_params=pltpu.CompilerParams(
            dimension_semantics=("parallel",),
            vmem_limit_bytes=_VMEM_LIMIT),
        cost_estimate=pl.CostEstimate(flops=int(3 * N * C_out * T), transcendentals=0,
                                      bytes_accessed=int(N * C_out * T * 6 + 8 * C_out)),
    )(conv, scale3, shift3)
    return out


def conv_h_reference(x, w, b, gamma, beta):
    """Pure-JAX f32 reference, faithful to the PyTorch module (train-mode BN)."""
    N, C_in, F, T = x.shape
    C_out, _, K = w.shape
    pad = K // 2
    xm = jnp.mean(x, axis=2)                                     # AvgPool2d((F,1)) + squeeze
    xp = jnp.pad(xm, ((0, 0), (0, 0), (pad, pad)))
    conv = sum(jnp.einsum('oc,nct->not', w[:, :, k], xp[:, :, k:k + T]) for k in range(K))
    conv = conv + b[None, :, None]
    mean = jnp.mean(conv, axis=(0, 2), keepdims=True)
    var = jnp.mean((conv - mean) ** 2, axis=(0, 2), keepdims=True)
    y = (conv - mean) * jax.lax.rsqrt(var + BN_EPS) * gamma[None, :, None] + beta[None, :, None]
    return jnp.maximum(y, 0.0)


def conv_h_reference_bf16(x, w, b, gamma, beta):
    """Reference with the same bf16 rounding as the kernel (bf16 matmul operands +
    bf16 conv intermediate; BN stats from the f32 conv).  Separates structural errors
    from the expected MXU/bf16-dtype error.  The conv bias cancels under train-mode BN
    so it is omitted, matching the kernel's bias-free intermediate."""
    N, C_in, F, T = x.shape
    C_out, _, K = w.shape
    pad = K // 2
    xs = jnp.sum(x, axis=2).astype(jnp.bfloat16)
    xp = jnp.pad(xs, ((0, 0), (0, 0), (pad, pad)))
    wk = (jnp.transpose(w, (0, 2, 1)) * (1.0 / F)).astype(jnp.bfloat16)    # (C_out, K, C_in)
    conv = sum(jnp.einsum('oc,nct->not', wk[:, k], xp[:, :, k:k + T],
                          preferred_element_type=jnp.float32) for k in range(K))
    mean = jnp.mean(conv, axis=(0, 2), keepdims=True)
    var = jnp.mean((conv - mean) ** 2, axis=(0, 2), keepdims=True)
    conv_q = conv.astype(jnp.bfloat16).astype(jnp.float32)                 # bf16 intermediate
    y = (conv_q - mean) * jax.lax.rsqrt(var + BN_EPS) * gamma[None, :, None] + beta[None, :, None]
    return jnp.maximum(y, 0.0)


def _run_case(name, N, C_in, C_out, F, T, K, key, tile_list):
    kx, kw, kb, kg, kbe = jax.random.split(key, 5)
    x = jax.random.normal(kx, (N, C_in, F, T), dtype=jnp.float32)
    fan_in = C_in * K
    bound = 1.0 / (fan_in ** 0.5)
    w = jax.random.uniform(kw, (C_out, C_in, K), jnp.float32, -bound, bound)
    b = jax.random.uniform(kb, (C_out,), jnp.float32, -bound, bound)
    gamma = jax.random.uniform(kg, (C_out,), jnp.float32, 0.5, 1.5)
    beta = 0.1 * jax.random.normal(kbe, (C_out,), jnp.float32)

    ref32 = conv_h_reference(x, w, b, gamma, beta)
    refbf = conv_h_reference_bf16(x, w, b, gamma, beta)
    for tt in tile_list:
        out = jax.block_until_ready(conv_h_forward(x, w, b, gamma, beta, tile_t=tt))
        assert out.shape == (N, C_out, T), (name, out.shape)
        err_bf = float(jnp.max(jnp.abs(out - refbf)))
        err_32 = float(jnp.max(jnp.abs(out - ref32)))
        # Tight check vs. the bf16-matched reference (structure), loose vs. pure f32
        # (bounds the expected bf16-operand / bf16-intermediate drift).
        assert jnp.allclose(out, refbf, atol=2e-2, rtol=2e-2), (name, tt, err_bf)
        assert jnp.allclose(out, ref32, atol=1e-1, rtol=1e-1), (name, tt, err_32)


if __name__ == "__main__":
    root = jax.random.PRNGKey(0)
    k1, k2 = jax.random.split(root)
    # T not a multiple of 128 -> exercises the partial-last-tile masking; even N ->
    # exercises the 2-way "parallel" batch split.  tile_t=128 forces multi-tile halos,
    # tile_t=None uses the VMEM-budget heuristic (single tile at these shapes).
    _run_case("case1", N=2, C_in=4, C_out=8, F=16, T=192, K=3, key=k1, tile_list=(128, None))
    # Odd batch (no split), C_in not a multiple of 8, wider filter (pad=2), exact tiles.
    _run_case("case2", N=3, C_in=3, C_out=16, F=4, T=256, K=5, key=k2, tile_list=(128, None))
    print("KERNEL_OK")
</pallas_src>

<mosaic_0001>
module attributes {stable_mosaic.version = 11 : i64} {
  func.func @phase1_kernel(%arg0: i32, %arg1: i32, %arg2: memref<1x4x16x128xf32, #tpu.memory_space<vmem>>, %arg3: memref<1x1x4x1xf32, #tpu.memory_space<vmem>>, %arg4: memref<1x1x4x1xf32, #tpu.memory_space<vmem>>, %arg5: memref<8x12xbf16, #tpu.memory_space<vmem>>, %arg6: memref<1x8x128xbf16, #tpu.memory_space<vmem>>, %arg7: memref<1x8x1xf32, #tpu.memory_space<vmem>>, %arg8: memref<1x8x1xf32, #tpu.memory_space<vmem>>, %arg9: memref<4x128xf32, #tpu.memory_space<vmem>>, %arg10: memref<12x128xf32, #tpu.memory_space<vmem>>) attributes {dimension_semantics = [#tpu.dimension_semantics<parallel>, #tpu.dimension_semantics<arbitrary>], iteration_bounds = array<i64: 2, 2>, scalar_prefetch = 0 : i64, scratch_operands = 2 : i64, tpu.core_type = #tpu.core_type<tc>, window_params = [{transform_indices = @transform_0, window_bounds = array<i64: 1, 4, 16, 128>}, {transform_indices = @transform_1, window_bounds = array<i64: 1, 1, 4, 1>}, {transform_indices = @transform_2, window_bounds = array<i64: 1, 1, 4, 1>}, {pipeline_mode = #tpu.pipeline_mode<synchronous>, transform_indices = @transform_3, window_bounds = array<i64: 8, 12>}, {transform_indices = @transform_4, window_bounds = array<i64: 1, 8, 128>}, {transform_indices = @transform_5, window_bounds = array<i64: 1, 8, 1>}, {transform_indices = @transform_6, window_bounds = array<i64: 1, 8, 1>}]} {
    %c0 = arith.constant 0 : index
    %c0_0 = arith.constant 0 : index
    %c0_1 = arith.constant 0 : index
    %c0_2 = arith.constant 0 : index
    %0 = vector.load %arg2[%c0, %c0_0, %c0_1, %c0_2] : memref<1x4x16x128xf32, #tpu.memory_space<vmem>>, vector<1x4x16x128xf32>
    %1 = vector.shape_cast %0 : vector<1x4x16x128xf32> to vector<4x16x128xf32>
    %cst = arith.constant dense<0.000000e+00> : vector<4x128xf32>
    %2 = vector.multi_reduction <add>, %1, %cst [1] : vector<4x16x128xf32> to vector<4x128xf32>
    %c0_3 = arith.constant 0 : index
    %c0_4 = arith.constant 0 : index
    %3 = vector.load %arg9[%c0_3, %c0_4] : memref<4x128xf32, #tpu.memory_space<vmem>>, vector<4x128xf32>
    tpu.vector_store %arg9[%c0_3, %c0_4], %2 {strides = array<i32>} : memref<4x128xf32, #tpu.memory_space<vmem>>, vector<4x128xf32>,
    %c1_i32 = arith.constant 1 : i32
    %4 = arith.cmpi eq, %arg1, %c1_i32 : i32
    %5 = arith.extui %4 : i1 to i32
    %c0_i32 = arith.constant 0 : i32
    %6 = arith.cmpi ne, %5, %c0_i32 : i32
    scf.if %6 {
      %36 = tpu.iota {dimensions = array<i32: 1>} : vector<1x128xi32>
      %c128_i32 = arith.constant 128 : i32
      %c0_i32_37 = arith.constant 0 : i32
      %37 = arith.cmpi eq, %c128_i32, %c0_i32_37 : i32
      %c1_i32_38 = arith.constant 1 : i32
      %38 = arith.select %37, %c1_i32_38, %c128_i32 : i32
      %39 = vector.broadcast %38 : i32 to vector<1x128xi32>
      %40 = arith.remsi %36, %39 : vector<1x128xi32>
      %c0_i32_39 = arith.constant 0 : i32
      %41 = vector.broadcast %c0_i32_39 : i32 to vector<1x128xi32>
      %42 = arith.cmpi ne, %40, %41 : vector<1x128xi32>
      %c0_i32_40 = arith.constant 0 : i32
      %43 = vector.broadcast %c0_i32_40 : i32 to vector<1x128xi32>
      %44 = arith.cmpi slt, %40, %43 : vector<1x128xi32>
      %c0_i32_41 = arith.constant 0 : i32
      %45 = arith.cmpi slt, %38, %c0_i32_41 : i32
      %46 = vector.broadcast %45 : i1 to vector<1x128xi1>
      %47 = vector.broadcast %46 : vector<1x128xi1> to vector<1x128xi1>
      %48 = arith.xori %44, %47 : vector<1x128xi1>
      %49 = arith.andi %48, %42 : vector<1x128xi1>
      %50 = vector.broadcast %38 : i32 to vector<1x128xi32>
      %51 = arith.addi %40, %50 : vector<1x128xi32>
      %52 = arith.select %49, %51, %40 : vector<1x128xi1>, vector<1x128xi32>
      %c64_i32 = arith.constant 64 : i32
      %53 = vector.broadcast %c64_i32 : i32 to vector<1x128xi32>
      %54 = arith.cmpi slt, %52, %53 : vector<1x128xi32>
      %c0_42 = arith.constant 0 : index
      %c0_43 = arith.constant 0 : index
      %55 = vector.load %arg9[%c0_42, %c0_43] : memref<4x128xf32, #tpu.memory_space<vmem>>, vector<4x128xf32>
      %cst_44 = arith.constant 0.000000e+00 : f32
      %56 = vector.shape_cast %54 : vector<1x128xi1> to vector<1x128xi1>
      %57 = vector.broadcast %56 : vector<1x128xi1> to vector<4x128xi1>
      %58 = vector.broadcast %cst_44 : f32 to vector<4x128xf32>
      %59 = arith.select %57, %55, %58 : vector<4x128xi1>, vector<4x128xf32>
      %c0_45 = arith.constant 0 : index
      %c0_46 = arith.constant 0 : index
      %60 = vector.load %arg9[%c0_45, %c0_46] : memref<4x128xf32, #tpu.memory_space<vmem>>, vector<4x128xf32>
      tpu.vector_store %arg9[%c0_45, %c0_46], %59 {strides = array<i32>} : memref<4x128xf32, #tpu.memory_space<vmem>>, vector<4x128xf32>,
    } else {
    }
    %c0_5 = arith.constant 0 : index
    %c0_6 = arith.constant 0 : index
    %7 = vector.load %arg9[%c0_5, %c0_6] : memref<4x128xf32, #tpu.memory_space<vmem>>, vector<4x128xf32>
    %c1_i32_7 = arith.constant 1 : i32
    %8 = tpu.dynamic_rotate %7 by %c1_i32_7 dim 1 : vector<4x128xf32>, i32 -> vector<4x128xf32>
    %c0_8 = arith.constant 0 : index
    %c0_9 = arith.constant 0 : index
    %9 = vector.load %arg10[%c0_8, %c0_9] : memref<12x128xf32, #tpu.memory_space<vmem>>, vector<4x128xf32>
    tpu.vector_store %arg10[%c0_8, %c0_9], %8 {strides = array<i32>} : memref<12x128xf32, #tpu.memory_space<vmem>>, vector<4x128xf32>,
    %c4 = arith.constant 4 : index
    %c0_10 = arith.constant 0 : index
    %10 = vector.load %arg10[%c4, %c0_10] : memref<12x128xf32, #tpu.memory_space<vmem>>, vector<4x128xf32>
    tpu.vector_store %arg10[%c4, %c0_10], %7 {strides = array<i32>} : memref<12x128xf32, #tpu.memory_space<vmem>>, vector<4x128xf32>,
    %c127_i32 = arith.constant 127 : i32
    %11 = tpu.dynamic_rotate %7 by %c127_i32 dim 1 : vector<4x128xf32>, i32 -> vector<4x128xf32>
    %c8 = arith.constant 8 : index
    %c0_11 = arith.constant 0 : index
    %12 = vector.load %arg10[%c8, %c0_11] : memref<12x128xf32, #tpu.memory_space<vmem>>, vector<4x128xf32>
    tpu.vector_store %arg10[%c8, %c0_11], %11 {strides = array<i32>} : memref<12x128xf32, #tpu.memory_space<vmem>>, vector<4x128xf32>,
    %c0_12 = arith.constant 0 : index
    %c0_13 = arith.constant 0 : index
    %c0_14 = arith.constant 0 : index
    %c0_15 = arith.constant 0 : index
    %13 = vector.load %arg3[%c0_12, %c0_13, %c0_14, %c0_15] : memref<1x1x4x1xf32, #tpu.memory_space<vmem>>, vector<1x1x4x1xf32>
    %14 = vector.shape_cast %13 : vector<1x1x4x1xf32> to vector<4x1xf32>
    %c0_16 = arith.constant 0 : index
    %c0_17 = arith.constant 0 : index
    %15 = vector.load %arg10[%c0_16, %c0_17] : memref<12x128xf32, #tpu.memory_space<vmem>>, vector<4x1xf32>
    tpu.vector_store %arg10[%c0_16, %c0_17], %14 {strides = array<i32>} : memref<12x128xf32, #tpu.memory_space<vmem>>, vector<4x1xf32>,
    %c0_18 = arith.constant 0 : index
    %c0_19 = arith.constant 0 : index
    %c0_20 = arith.constant 0 : index
    %c0_21 = arith.constant 0 : index
    %16 = vector.load %arg4[%c0_18, %c0_19, %c0_20, %c0_21] : memref<1x1x4x1xf32, #tpu.memory_space<vmem>>, vector<1x1x4x1xf32>
    %17 = vector.shape_cast %16 : vector<1x1x4x1xf32> to vector<4x1xf32>
    %c8_22 = arith.constant 8 : index
    %c127 = arith.constant 127 : index
    %18 = vector.load %arg10[%c8_22, %c127] : memref<12x128xf32, #tpu.memory_space<vmem>>, vector<4x1xf32>
    tpu.vector_store %arg10[%c8_22, %c127], %17 {strides = array<i32>} : memref<12x128xf32, #tpu.memory_space<vmem>>, vector<4x1xf32>,
    %c0_23 = arith.constant 0 : index
    %c0_24 = arith.constant 0 : index
    %19 = vector.load %arg5[%c0_23, %c0_24] : memref<8x12xbf16, #tpu.memory_space<vmem>>, vector<8x12xbf16>
    %c0_25 = arith.constant 0 : index
    %c0_26 = arith.constant 0 : index
    %20 = vector.load %arg10[%c0_25, %c0_26] : memref<12x128xf32, #tpu.memory_space<vmem>>, vector<12x128xf32>
    %21 = arith.truncf %20 : vector<12x128xf32> to vector<12x128xbf16>
    %cst_27 = arith.constant dense<0.000000e+00> : vector<8x128xf32>
    %22 = tpu.matmul %19, %21, %cst_27 {dimension_numbers = #tpu.dot_dimension_numbers<[1], [0], [0], [1], [0, 0, 1, 1], [], []>} : vector<8x12xbf16>, vector<12x128xbf16>, vector<8x128xf32> -> vector<8x128xf32>
    %23 = arith.truncf %22 : vector<8x128xf32> to vector<8x128xbf16>
    %c0_28 = arith.constant 0 : index
    %c0_29 = arith.constant 0 : index
    %c0_30 = arith.constant 0 : index
    %24 = vector.load %arg6[%c0_28, %c0_29, %c0_30] : memref<1x8x128xbf16, #tpu.memory_space<vmem>>, vector<1x8x128xbf16>
    %25 = vector.shape_cast %24 : vector<1x8x128xbf16> to vector<8x128xbf16>
    %26 = vector.shape_cast %23 : vector<8x128xbf16> to vector<1x8x128xbf16>
    tpu.vector_store %arg6[%c0_28, %c0_29, %c0_30], %26 {strides = array<i32>} : memref<1x8x128xbf16, #tpu.memory_space<vmem>>, vector<1x8x128xbf16>,
    %c0_i32_31 = arith.constant 0 : i32
    %27 = arith.cmpi eq, %arg1, %c0_i32_31 : i32
    %28 = arith.extui %27 : i1 to i32
    %c0_i32_32 = arith.constant 0 : i32
    %29 = arith.cmpi ne, %28, %c0_i32_32 : i32
    scf.if %29 {
      %cst_37 = arith.constant 0.000000e+00 : f32
      %36 = vector.broadcast %cst_37 : f32 to vector<8x1xf32>
      %c0_38 = arith.constant 0 : index
      %c0_39 = arith.constant 0 : index
      %c0_40 = arith.constant 0 : index
      %37 = vector.load %arg7[%c0_38, %c0_39, %c0_40] : memref<1x8x1xf32, #tpu.memory_space<vmem>>, vector<1x8x1xf32>
      %38 = vector.shape_cast %37 : vector<1x8x1xf32> to vector<8x1xf32>
      %39 = vector.shape_cast %36 : vector<8x1xf32> to vector<1x8x1xf32>
      tpu.vector_store %arg7[%c0_38, %c0_39, %c0_40], %39 {strides = array<i32>} : memref<1x8x1xf32, #tpu.memory_space<vmem>>, vector<1x8x1xf32>,
      %cst_41 = arith.constant 0.000000e+00 : f32
      %40 = vector.broadcast %cst_41 : f32 to vector<8x1xf32>
      %c0_42 = arith.constant 0 : index
      %c0_43 = arith.constant 0 : index
      %c0_44 = arith.constant 0 : index
      %41 = vector.load %arg8[%c0_42, %c0_43, %c0_44] : memref<1x8x1xf32, #tpu.memory_space<vmem>>, vector<1x8x1xf32>
      %42 = vector.shape_cast %41 : vector<1x8x1xf32> to vector<8x1xf32>
      %43 = vector.shape_cast %40 : vector<8x1xf32> to vector<1x8x1xf32>
      tpu.vector_store %arg8[%c0_42, %c0_43, %c0_44], %43 {strides = array<i32>} : memref<1x8x1xf32, #tpu.memory_space<vmem>>, vector<1x8x1xf32>,
    } else {
    }
    %c1_i32_33 = arith.constant 1 : i32
    %30 = arith.cmpi ne, %arg1, %c1_i32_33 : i32
    %31 = arith.extui %30 : i1 to i32
    %c0_i32_34 = arith.constant 0 : i32
    %32 = arith.cmpi ne, %31, %c0_i32_34 : i32
    scf.if %32 {
      %c0_37 = arith.constant 0 : index
      %c0_38 = arith.constant 0 : index
      %c0_39 = arith.constant 0 : index
      %36 = vector.load %arg7[%c0_37, %c0_38, %c0_39] : memref<1x8x1xf32, #tpu.memory_space<vmem>>, vector<1x8x1xf32>
      %37 = vector.shape_cast %36 : vector<1x8x1xf32> to vector<8x1xf32>
      %cst_40 = arith.constant dense<0.000000e+00> : vector<8xf32>
      %38 = vector.multi_reduction <add>, %22, %cst_40 [1] : vector<8x128xf32> to vector<8xf32>
      %39 = vector.shape_cast %38 : vector<8xf32> to vector<8x1xf32>
      %40 = arith.addf %37, %39 : vector<8x1xf32>
      %c0_41 = arith.constant 0 : index
      %c0_42 = arith.constant 0 : index
      %c0_43 = arith.constant 0 : index
      %41 = vector.load %arg7[%c0_41, %c0_42, %c0_43] : memref<1x8x1xf32, #tpu.memory_space<vmem>>, vector<1x8x1xf32>
      %42 = vector.shape_cast %41 : vector<1x8x1xf32> to vector<8x1xf32>
      %43 = vector.shape_cast %40 : vector<8x1xf32> to vector<1x8x1xf32>
      tpu.vector_store %arg7[%c0_41, %c0_42, %c0_43], %43 {strides = array<i32>} : memref<1x8x1xf32, #tpu.memory_space<vmem>>, vector<1x8x1xf32>,
      %c0_44 = arith.constant 0 : index
      %c0_45 = arith.constant 0 : index
      %c0_46 = arith.constant 0 : index
      %44 = vector.load %arg8[%c0_44, %c0_45, %c0_46] : memref<1x8x1xf32, #tpu.memory_space<vmem>>, vector<1x8x1xf32>
      %45 = vector.shape_cast %44 : vector<1x8x1xf32> to vector<8x1xf32>
      %46 = arith.mulf %22, %22 : vector<8x128xf32>
      %cst_47 = arith.constant dense<0.000000e+00> : vector<8xf32>
      %47 = vector.multi_reduction <add>, %46, %cst_47 [1] : vector<8x128xf32> to vector<8xf32>
      %48 = vector.shape_cast %47 : vector<8xf32> to vector<8x1xf32>
      %49 = arith.addf %45, %48 : vector<8x1xf32>
      %c0_48 = arith.constant 0 : index
      %c0_49 = arith.constant 0 : index
      %c0_50 = arith.constant 0 : index
      %50 = vector.load %arg8[%c0_48, %c0_49, %c0_50] : memref<1x8x1xf32, #tpu.memory_space<vmem>>, vector<1x8x1xf32>
      %51 = vector.shape_cast %50 : vector<1x8x1xf32> to vector<8x1xf32>
      %52 = vector.shape_cast %49 : vector<8x1xf32> to vector<1x8x1xf32>
      tpu.vector_store %arg8[%c0_48, %c0_49, %c0_50], %52 {strides = array<i32>} : memref<1x8x1xf32, #tpu.memory_space<vmem>>, vector<1x8x1xf32>,
    } else {
    }
    %c1_i32_35 = arith.constant 1 : i32
    %33 = arith.cmpi eq, %arg1, %c1_i32_35 : i32
    %34 = arith.extui %33 : i1 to i32
    %c0_i32_36 = arith.constant 0 : i32
    %35 = arith.cmpi ne, %34, %c0_i32_36 : i32
    scf.if %35 {
      %36 = tpu.iota {dimensions = array<i32: 1>} : vector<1x128xi32>
      %c128_i32 = arith.constant 128 : i32
      %c0_i32_37 = arith.constant 0 : i32
      %37 = arith.cmpi eq, %c128_i32, %c0_i32_37 : i32
      %c1_i32_38 = arith.constant 1 : i32
      %38 = arith.select %37, %c1_i32_38, %c128_i32 : i32
      %39 = vector.broadcast %38 : i32 to vector<1x128xi32>
      %40 = arith.remsi %36, %39 : vector<1x128xi32>
      %c0_i32_39 = arith.constant 0 : i32
      %41 = vector.broadcast %c0_i32_39 : i32 to vector<1x128xi32>
      %42 = arith.cmpi ne, %40, %41 : vector<1x128xi32>
      %c0_i32_40 = arith.constant 0 : i32
      %43 = vector.broadcast %c0_i32_40 : i32 to vector<1x128xi32>
      %44 = arith.cmpi slt, %40, %43 : vector<1x128xi32>
      %c0_i32_41 = arith.constant 0 : i32
      %45 = arith.cmpi slt, %38, %c0_i32_41 : i32
      %46 = vector.broadcast %45 : i1 to vector<1x128xi1>
      %47 = vector.broadcast %46 : vector<1x128xi1> to vector<1x128xi1>
      %48 = arith.xori %44, %47 : vector<1x128xi1>
      %49 = arith.andi %48, %42 : vector<1x128xi1>
      %50 = vector.broadcast %38 : i32 to vector<1x128xi32>
      %51 = arith.addi %40, %50 : vector<1x128xi32>
      %52 = arith.select %49, %51, %40 : vector<1x128xi1>, vector<1x128xi32>
      %c64_i32 = arith.constant 64 : i32
      %53 = vector.broadcast %c64_i32 : i32 to vector<1x128xi32>
      %54 = arith.cmpi slt, %52, %53 : vector<1x128xi32>
      %cst_42 = arith.constant 0.000000e+00 : f32
      %55 = vector.shape_cast %54 : vector<1x128xi1> to vector<1x128xi1>
      %56 = vector.broadcast %55 : vector<1x128xi1> to vector<8x128xi1>
      %57 = vector.broadcast %cst_42 : f32 to vector<8x128xf32>
      %58 = arith.select %56, %22, %57 : vector<8x128xi1>, vector<8x128xf32>
      %c0_43 = arith.constant 0 : index
      %c0_44 = arith.constant 0 : index
      %c0_45 = arith.constant 0 : index
      %59 = vector.load %arg7[%c0_43, %c0_44, %c0_45] : memref<1x8x1xf32, #tpu.memory_space<vmem>>, vector<1x8x1xf32>
      %60 = vector.shape_cast %59 : vector<1x8x1xf32> to vector<8x1xf32>
      %cst_46 = arith.constant dense<0.000000e+00> : vector<8xf32>
      %61 = vector.multi_reduction <add>, %58, %cst_46 [1] : vector<8x128xf32> to vector<8xf32>
      %62 = vector.shape_cast %61 : vector<8xf32> to vector<8x1xf32>
      %63 = arith.addf %60, %62 : vector<8x1xf32>
      %c0_47 = arith.constant 0 : index
      %c0_48 = arith.constant 0 : index
      %c0_49 = arith.constant 0 : index
      %64 = vector.load %arg7[%c0_47, %c0_48, %c0_49] : memref<1x8x1xf32, #tpu.memory_space<vmem>>, vector<1x8x1xf32>
      %65 = vector.shape_cast %64 : vector<1x8x1xf32> to vector<8x1xf32>
      %66 = vector.shape_cast %63 : vector<8x1xf32> to vector<1x8x1xf32>
      tpu.vector_store %arg7[%c0_47, %c0_48, %c0_49], %66 {strides = array<i32>} : memref<1x8x1xf32, #tpu.memory_space<vmem>>, vector<1x8x1xf32>,
      %c0_50 = arith.constant 0 : index
      %c0_51 = arith.constant 0 : index
      %c0_52 = arith.constant 0 : index
      %67 = vector.load %arg8[%c0_50, %c0_51, %c0_52] : memref<1x8x1xf32, #tpu.memory_space<vmem>>, vector<1x8x1xf32>
      %68 = vector.shape_cast %67 : vector<1x8x1xf32> to vector<8x1xf32>
      %69 = arith.mulf %58, %58 : vector<8x128xf32>
      %cst_53 = arith.constant dense<0.000000e+00> : vector<8xf32>
      %70 = vector.multi_reduction <add>, %69, %cst_53 [1] : vector<8x128xf32> to vector<8xf32>
      %71 = vector.shape_cast %70 : vector<8xf32> to vector<8x1xf32>
      %72 = arith.addf %68, %71 : vector<8x1xf32>
      %c0_54 = arith.constant 0 : index
      %c0_55 = arith.constant 0 : index
      %c0_56 = arith.constant 0 : index
      %73 = vector.load %arg8[%c0_54, %c0_55, %c0_56] : memref<1x8x1xf32, #tpu.memory_space<vmem>>, vector<1x8x1xf32>
      %74 = vector.shape_cast %73 : vector<1x8x1xf32> to vector<8x1xf32>
      %75 = vector.shape_cast %72 : vector<8x1xf32> to vector<1x8x1xf32>
      tpu.vector_store %arg8[%c0_54, %c0_55, %c0_56], %75 {strides = array<i32>} : memref<1x8x1xf32, #tpu.memory_space<vmem>>, vector<1x8x1xf32>,
    } else {
    }
    return
  }
  func.func @transform_0(%arg0: i32, %arg1: i32) -> (i32, i32, i32, i32) {
    %c0_i32 = arith.constant 0 : i32
    %c0_i32_0 = arith.constant 0 : i32
    %c0_i32_1 = arith.constant 0 : i32
    return %arg0, %c0_i32, %c0_i32_0, %arg1 : i32, i32, i32, i32
  }
  func.func @transform_1(%arg0: i32, %arg1: i32) -> (i32, i32, i32, i32) {
    %c0_i32 = arith.constant 0 : i32
    %c0_i32_0 = arith.constant 0 : i32
    %c0_i32_1 = arith.constant 0 : i32
    return %arg1, %arg0, %c0_i32, %c0_i32_0 : i32, i32, i32, i32
  }
  func.func @transform_2(%arg0: i32, %arg1: i32) -> (i32, i32, i32, i32) {
    %c0_i32 = arith.constant 0 : i32
    %c0_i32_0 = arith.constant 0 : i32
    %c0_i32_1 = arith.constant 0 : i32
    return %arg1, %arg0, %c0_i32, %c0_i32_0 : i32, i32, i32, i32
  }
  func.func @transform_3(%arg0: i32, %arg1: i32) -> (i32, i32) {
    %c0_i32 = arith.constant 0 : i32
    %c0_i32_0 = arith.constant 0 : i32
    %c0_i32_1 = arith.constant 0 : i32
    return %c0_i32, %c0_i32_0 : i32, i32
  }
  func.func @transform_4(%arg0: i32, %arg1: i32) -> (i32, i32, i32) {
    %c0_i32 = arith.constant 0 : i32
    %c0_i32_0 = arith.constant 0 : i32
    return %arg0, %c0_i32, %arg1 : i32, i32, i32
  }
  func.func @transform_5(%arg0: i32, %arg1: i32) -> (i32, i32, i32) {
    %c0_i32 = arith.constant 0 : i32
    %c0_i32_0 = arith.constant 0 : i32
    %c0_i32_1 = arith.constant 0 : i32
    return %arg0, %c0_i32, %c0_i32_0 : i32, i32, i32
  }
  func.func @transform_6(%arg0: i32, %arg1: i32) -> (i32, i32, i32) {
    %c0_i32 = arith.constant 0 : i32
    %c0_i32_0 = arith.constant 0 : i32
    %c0_i32_1 = arith.constant 0 : i32
    return %arg0, %c0_i32, %c0_i32_0 : i32, i32, i32
  }
}

</mosaic_0001>

<bundles_post_ra>
// kernel: tpu_custom_call.1
= control target key start
LH: loop header
LB: loop body
LE: loop exit
PB: predicated region body
PF: predicated region fallthrough
CT: control target
= control target key end

     0   :  { %12 = vsyncpa [#allocation5], 0  ;;  %s1223_s0 = inlined_call_operand.hbm [shape: f32[2,4,16,192], index: 0, kind: input, shape index: {}]   ;;  %s1224_s1 = inlined_call_operand.vmem [shape: f32[2,2,4,1], index: 1, kind: input, shape index: {}]   ;;  %s1225_s2 = inlined_call_operand.vmem [shape: f32[2,2,4,1], index: 2, kind: input, shape index: {}]   ;;  %s1226_s3 = inlined_call_operand.vmem [shape: bf16[8,12], index: 3, kind: input, shape index: {}]   ;;  %s1227_s4 = inlined_call_operand.hbm [shape: bf16[2,8,192], index: 4, kind: output, shape index: {0}]   ;;  %s1228_s5 = inlined_call_operand.vmem [shape: f32[2,8,1], index: 5, kind: output, shape index: {1}]   ;;  %s1229_s6 = inlined_call_operand.vmem [shape: f32[2,8,1], index: 6, kind: output, shape index: {2}]  }
   0x1   :  { %14 = vsyncpa [#allocation5 + $0x1], 0 }
   0x2   :  { %15 = vsyncpa [#allocation6], 0 }
   0x3   :  { %17 = vsyncpa [#allocation6 + $0x1], 0  ;;  %s1028_s21 = smov 0   ;;  %s1030_s22 = smov 0  }
   0x4   :  { %s1032_s23 = smov 0   ;;  %s1034_s24 = smov 0  }
   0x5   :  { %s1036_s25 = smov 0   ;;  %s1038_s26 = smov 0  }
   0x6   :  { %s1040_s27 = smov 0   ;;  %s1042_s28 = smov 0  }
   0x7 LB: > { %1235 = sst [smem:[#allocation10_spill]] %s957_s21  ;;  %s747_s29 = sadd.s32 4294967295, %s985_s28   ;;  %s985_s28 = sphi %s1042_s28, %s23_s28   ;;  %s981_s27 = sphi %s1040_s27, %s1257_s27   ;;  %s977_s26 = sphi %s1038_s26, %s1256_s26   ;;  %s973_s25 = sphi %s1036_s25, %s1255_s25   ;;  %s969_s24 = sphi %s1034_s24, %s1254_s24   ;;  %s965_s23 = sphi %s1032_s23, %s1249_s23   ;;  %s961_s22 = sphi %s1030_s22, %s1253_s22   ;;  %s957_s21 = sphi %s1028_s21, %s1252_s21  }
   0x8   : > { %1236 = sst [smem:[#allocation11_spill]] %s965_s23  ;;  %s748_s30 = sadd.s32 4294967294, %s985_s28  }
   0x9   : > { %s32_s7 = sadd.s32 1, %s977_s26  ;;  %s35_s8 = sadd.s32 1, %s981_s27 }
   0xa   : > { %p33_p0 = scmp.ge.s32.totalorder %s32_s7, 2  ;;  %s44_s9 = sadd.s32 1, %s965_s23 }
   0xb   : > { %p51_p1 = scmp.ne.s32.totalorder %s965_s23, %s961_s22  ;;  %p52_p2 = scmp.eq.s32.totalorder %s985_s28, 0 }
   0xc   : > { %s1259_s7 = smov (%p33_p0, %s32_s7), 0  ;;  %s1261_s8 = smov (!%p33_p0, %s35_s8), %s981_s27 }
   0xd   : > { %1237 = sst [smem:[#allocation12_spill]] %s1259_s7  ;;  %s40_s10 = ssub.s32 %s977_s26, %s1259_s7 }
   0xe   : > { %p1081_p3 = por %p52_p2, %p51_p1  ;;  %p37_p4 = scmp.ge.s32.totalorder %s1261_s8, 2 }
   0xf   : > { %p57_p5 = scmp.ne.s32.totalorder %s961_s22, %s957_s21  ;;  %p58_p6 = scmp.eq.s32.totalorder %s747_s29, 0 }
  0x10   : > { %p160_p7 = scmp.eq.s32.totalorder %s747_s29, 3  ;;  %s1263_s8 = smov (%p37_p4, %s1261_s8), 0 }
  0x11   : > { %1239 = sst [smem:[#allocation13_spill]] %s1263_s8  ;;  %p1089_p8 = por %p58_p6, %p57_p5 }
  0x12   : > { %p1093_p9 = por %p160_p7, %p51_p1  ;;  %s39_s14 = ssub.s32 %s981_s27, %s1263_s8 }
  0x13   : > { %p166_p10 = scmp.eq.s32.totalorder %s748_s30, 3  ;;  %s41_s15 = sor.u32 %s40_s10, %s39_s14 }
  0x14   : > { %p42_p11 = scmp.eq.s32.totalorder %s41_s15, 0  ;;  %p785_p13 = scmp.lt.s32.totalorder %s985_s28, 4 }
  0x15   : > { %p1099_p12 = por %p166_p10, %p57_p5  ;;  %s241_s17 = sand.u32 1, %s965_s23  }
  0x16   : > { %s1106_s18 = scalar_select %p42_p11, %s965_s23, %s44_s9  }
  0x17   : > { %s1242_s16 = scalar_select %p1099_p12, 1, 0 }
  0x18   : > { %1244 = sst [smem:[#allocation15_spill]] %s1106_s18  ;;  %s751_s19 = sshll.u32 %s241_s17, 6 }
  0x19   : > { %1243 = sst [smem:[#allocation14_spill]] %s1242_s16  ;;  %s752_s20 = sshll.u32 %s981_s27, 4 }
  0x1a   : > { %s249_s29 = sadd.s32 %s977_s26, %s752_s20  ;;  %s245_s7 = scalar_lea.vmem [#allocation4], %s751_s19 }
  0x1b   : > { %s254_s21 = sshll.u32 %s245_s7, 4  ;;  %s753_s8 = sshll.u32 %s249_s29, 3  ;;  %s255_s21 = int_to_ptr.vmem [resolvable:$true] %s254_s21 }
  0x1c   : > { %s251_s14 = scalar_lea.hbm %s1223_s0, %s753_s8  ;;  %p778_p0 = pnand %p785_p13, %p1081_p3 }
  0x1d   : > { %s252_s15 = sshll.u32 %s251_s14, 4  ;;  %s242_s16 = scalar_lea.sflag [#allocation5], %s241_s17  ;;  %s253_s15 = int_to_ptr.hbm [resolvable:$true] %s252_s15 }
  0x1e   : > { %s987_s9 = smov 256   ;;  %s988_s18 = smov 128  }
  0x1f   : > { %s989_s23 = smov 8   ;;  %p754_p1 = scmp.ge.s32.totalorder %s985_s28, 1 }
  0x20   : > { %780 = dma.hbm_to_vmem [thread:$0]  (!%p778_p0), %s253_s15, 1024, %s255_s21, %s242_s16, %s987_s9, %s988_s18, %s989_s23  }
  0x21   : > { %p284_p2 = scmp.lt.s32.totalorder %s985_s28, 5 }
  0x23   : > { %p285_p4 = pnand %p754_p1, %p284_p2 }
  0x24   : > { %s1118_s7 = sand.u32 (!%p285_p4), 1, %s961_s22  }
  0x25   : > { %288 = sbr.rel (%p285_p4) target bundleno = 643 (0x283), region = 36  ;;  %s755_s8 = sshll.u32 (!%p285_p4), %s1118_s7, 6 }
  0x26   : > { %s291_s11 = scalar_lea.sflag (!%p285_p4), [#allocation5], %s1118_s7  ;;  %s294_s19 = scalar_lea.vmem (!%p285_p4), [#allocation4], %s755_s8 }
  0x2a   : > { %948 = dma.done.wait (%p1089_p8), %s291_s11, 1024  }
  0x2b   : > { %950 = vsyncadd (%p1089_p8), %s291_s11, 4294966272  ;;  %p348_p3 = scmp.lt.s32.totalorder %s969_s24, 1  ;;  %p350_p5 = scmp.lt.s32.totalorder %s973_s25, 1  ;;  %v373_v0 = vld [vmem:[%s294_s19] sm:$0xff]  ;;  %v374_v1 = vld [vmem:[%s294_s19 + $0x8] sm:$0xff]  ;;  %vm413_vm0 = vcmask 1041409  }
  0x2c   : > { %v375_v2 = vld [vmem:[%s294_s19 + $0x10] sm:$0xff]  ;;  %v376_v3 = vld [vmem:[%s294_s19 + $0x18] sm:$0xff]  ;;  %v377_v4 = vld [vmem:[%s294_s19 + $0x20] sm:$0xff]  ;;  %v381_v6 = vadd.f32 %v374_v1, %v373_v0  ;;  %vm415_vm1 = vcmask 1042434   ;;  %vm417_vm2 = vcmask 1043459   ;;  %p763_p6 = scmp.ne.s32.totalorder %s969_s24, 1 }
  0x2d   : > { %s349_s23 = scalar_select %p348_p3, %s969_s24, 1  ;;  %v378_v5 = vld [vmem:[%s294_s19 + $0x28] sm:$0xff]  ;;  %v379_v7 = vld [vmem:[%s294_s19 + $0x30] sm:$0xff]  ;;  %v380_v8 = vld [vmem:[%s294_s19 + $0x38] sm:$0xff]  ;;  %v388_v9 = vadd.f32 %v376_v3, %v375_v2 }
  0x2e   : > { %s351_s16 = scalar_select %p350_p5, %s973_s25, 1  ;;  %v395_v10 = vadd.f32 %v378_v5, %v377_v4  ;;  %v382_v11 = vrot.slane %v381_v6, 4  ;;  %v402_v12 = vadd.f32 %v380_v8, %v379_v7 }
  0x2f   : > { %s757_s17 = sshll.u32 %s349_s23, 1  ;;  %v389_v13 = vrot.slane %v388_v9, 4  ;;  %s1245_s19 = sshll.u32 %s1118_s7, 2 }
  0x30   : > { %s353_s18 = sadd.s32 %s757_s17, %s351_s16  ;;  %s761_s20 = sshll.u32 %s351_s16, 3  ;;  %v396_v14 = vrot.slane %v395_v10, 4  ;;  %v383_v15 = vadd.f32 %v382_v11, %v381_v6  ;;  %v403_v16 = vrot.slane %v402_v12, 4 }
  0x31   : > { %s758_s29 = sshll.u32 %s353_s18, 2  ;;  %s1134_s14 = scalar_lea.vmem %s1228_s5, %s761_s20  ;;  %v390_v17 = vadd.f32 %v389_v13, %v388_v9 }
  0x32   : > { %s1139_s9 = scalar_lea.vmem %s1224_s1, %s758_s29  ;;  %s1144_s21 = scalar_lea.vmem %s1225_s2, %s758_s29  ;;  %v397_v18 = vadd.f32 %v396_v14, %v395_v10  ;;  %v384_v19 = vrot.slane %v383_v15, 2  ;;  %v404_v20 = vadd.f32 %v403_v16, %v402_v12 }
  0x33   : > { %s1149_s17 = scalar_lea.vmem %s1229_s6, %s761_s20  ;;  %v391_v21 = vrot.slane %v390_v17, 2  ;;  %s1153_s18 = scalar_lea.vmem [#allocation7], %s1245_s19 }
  0x34   : > { %v398_v22 = vrot.slane %v397_v18, 2  ;;  %v385_v23 = vadd.f32 %v384_v19, %v383_v15  ;;  %v405_v24 = vrot.slane %v404_v20, 2 }
  0x35   : > { %v392_v25 = vadd.f32 %v391_v21, %v390_v17 }
  0x36   : > { %v399_v26 = vadd.f32 %v398_v22, %v397_v18  ;;  %v386_v27 = vrot.slane %v385_v23, 1  ;;  %v406_v28 = vadd.f32 %v405_v24, %v404_v20 }
  0x37   : > { %v393_v29 = vrot.slane %v392_v25, 1 }
  0x38   : > { %v400_v30 = vrot.slane %v399_v26, 1  ;;  %v387_v31 = vadd.f32 %v386_v27, %v385_v23  ;;  %v407_v32 = vrot.slane %v406_v28, 1 }
  0x39   : > { %v394_v33 = vadd.f32 %v393_v29, %v392_v25 }
  0x3a   : > { %v401_v34 = vadd.f32 %v400_v30, %v399_v26  ;;  %v408_v35 = vadd.f32 %v407_v32, %v406_v28  ;;  %424 = sbr.rel (%p763_p6) target bundleno = 72 (0x48), region = 44 }
  0x3b   : > { %v414_v36 = vsel %vm413_vm0, %v394_v33, %v387_v31 }
  0x3c   : > { %v416_v37 = vsel %vm415_vm1, %v401_v34, %v414_v36 }
  0x3d   : > { %v418_v38 = vsel %vm417_vm2, %v408_v35, %v416_v37 }
  0x3e   : > { %420 = vst [vmem:[#allocation2] sm:$0xf] %v418_v38 }
  0x3f   : > { %v425_v39 = vlaneseq }
  0x41   : > { %v426_v40 = vand.u32 127, %v425_v39 }
  0x43   : > { %vm439_vm3 = vcmp.lt.s32.totalorder %v426_v40, 64 }
  0x45   : > { %v440_v41 = vld [vmem:[#allocation2] sm:$0xf] }
  0x46   : > { %v443_v42 = vsel %vm439_vm3, %v440_v41, 0.0 }
  0x47   : > { %444 = vst [vmem:[#allocation2] sm:$0xf] %v443_v42 }
  0x48 PF: > { %v456_v44 = vld [vmem:[%s1144_s21] sm:$0xf]  ;;  %s990_s20 = smov 1   ;;  %s991_s29 = smov 127   ;;  %vm454_vm4 = vcmask 3072   ;;  %vm461_vm5 = vcmask 1044472  }
  0x49   : > { %458 = vrot.lane.b32.xlu1 %v456_v44, %s991_s29  ;;  %v453_v45 = vld [vmem:[%s1139_s9] sm:$0xf]  ;;  %vm471_vm6 = vcmask 1045504   ;;  %vm467_vm7 = vcmask 97280   ;;  %p765_p7 = scmp.ne.s32.totalorder %s969_s24, 0 }
  0x4a   : > { %v463_v53 = vld [vmem:[%s1226_s3] sm:$0xf] }
  0x4e   : > { %v445_v43 = vld [vmem:[#allocation2] sm:$0xf] }
  0x4f   : > { %446 = vrot.lane.b32.xlu0 %v445_v43, %s990_s20  ;;  %449 = vst [vmem:[#allocation3 + $0x4] sm:$0xf] %v445_v43 }
  0x57   : > { %450 = vrot.lane.b32.xlu0 %v445_v43, %s991_s29 }
  0xbb   : > { %v459_v47 = vpop.permute.xlu1 %458 }
  0xc1   : > { %v447_v46 = vpop.permute.xlu0 %446 }
  0xc2   : > { %448 = vst [vmem:[#allocation3] sm:$0xf] %v447_v46 }
  0xc3   : > { %455 = vst.msk [vmem:[#allocation3] sm:$0xf] %vm454_vm4, %v453_v45 }
  0xc9   : > { %v451_v48 = vpop.permute.xlu0 %450 }
  0xca   : > { %452 = vst [vmem:[#allocation3 + $0x8] sm:$0xf] %v451_v48  ;;  %v464_v49 = vld [vmem:[#allocation3] sm:$0xff] }
  0xcb   : > { %462 = vst.msk [vmem:[#allocation3 + $0x8] sm:$0xf] %vm461_vm5, %v459_v47 }
  0xd2   : > { %v465_v50 = vld [vmem:[#allocation3 + $0x8] sm:$0xf] }
  0xd3   : > { %v466_v51 = vpack.c.bf16 %v465_v50, %v464_v49 }
  0xd5   : > { %v473_v52 = vsel %vm471_vm6, %v466_v51, 0 }
  0xd6   : > { %482 = vmatpush.bf16.msra.mxu0 %v473_v52 }
  0xd9   : > { %764 = vmatmul.msk.bf16.vlgmr.msra.gmra.mxu0 %vm467_vm7, %v463_v53 }
 0x156   : > { %v484_v54 = vpop.f32.mrf.mxu0 }
 0x157   : > { %v488_v55 = vpack.c.bf16 %v484_v54, %v484_v54 }
 0x159   : > { %489 = vst [vmem:[%s1153_s18] sm:$0xf] %v488_v55 }
 0x15a   : > { %493 = sbr.rel (%p765_p7) target bundleno = 354 (0x162), region = 48 }
 0x15e   : > { %v486_v56 = vpop.f32.mrf.mxu0 }
 0x15f   : > { %vm494_vm8 = vcmask 7168   ;;  %v992_v57 = vmov 0.0  }
 0x160   : > { %495 = vst.msk [vmem:[%s1134_s14] sm:$0xff] %vm494_vm8, %v992_v57 }
 0x161   : > { %496 = vst.msk [vmem:[%s1149_s17] sm:$0xff] %vm494_vm8, %v992_v57 }
 0x162 PF: > { %p766_p8 = scmp.eq.s32.totalorder %s969_s24, 1 }
 0x164   : > { %500 = sbr.rel (%p766_p8) target bundleno = 488 (0x1e8), region = 52 }
 0x169   : > { %502 = vadd.xlane.f32.xlu0 %v484_v54  ;;  %v508_v58 = vmul.f32 %v484_v54, %v484_v54  ;;  %v501_v59 = vld [vmem:[%s1134_s14] sm:$0xff]  ;;  %vm505_vm9 = vcmask 7168  }
 0x16a   : > { %v507_v62 = vld [vmem:[%s1149_s17] sm:$0xff] }
 0x171   : > { %509 = vadd.xlane.f32.xlu0 %v508_v58 }
 0x1dc   : > { %v503_v60 = vpop.xlane.xlu0 %502 }
 0x1dd   : > { %v504_v61 = vadd.f32 %v503_v60, %v501_v59 }
 0x1df   : > { %506 = vst.msk [vmem:[%s1134_s14] sm:$0xff] %vm505_vm9, %v504_v61 }
 0x1e4   : > { %v510_v63 = vpop.xlane.xlu0 %509 }
 0x1e5   : > { %v511_v0 = vadd.f32 %v510_v63, %v507_v62 }
 0x1e7   : > { %512 = vst.msk [vmem:[%s1149_s17] sm:$0xff] %vm505_vm9, %v511_v0 }
 0x1e8 PF: > { %515 = sbr.rel (%p763_p6) target bundleno = 626 (0x272), region = 56 }
 0x1ed   : > { %v516_v1 = vlaneseq  ;;  %v534_v5 = vld [vmem:[%s1134_s14] sm:$0xff]  ;;  %vm538_vm11 = vcmask 7168  }
 0x1ee   : > { %v540_v8 = vld [vmem:[%s1149_s17] sm:$0xff] }
 0x1ef   : > { %v517_v2 = vand.u32 127, %v516_v1 }
 0x1f1   : > { %vm530_vm10 = vcmp.lt.s32.totalorder %v517_v2, 64 }
 0x1f2   : > { %v533_v3 = vsel %vm530_vm10, %v484_v54, 0.0 }
 0x1f3   : > { %535 = vadd.xlane.f32.xlu0 %v533_v3  ;;  %v541_v4 = vmul.f32 %v533_v3, %v533_v3 }
 0x1fb   : > { %542 = vadd.xlane.f32.xlu0 %v541_v4 }
 0x266   : > { %v536_v6 = vpop.xlane.xlu0 %535 }
 0x267   : > { %v537_v7 = vadd.f32 %v536_v6, %v534_v5 }
 0x269   : > { %539 = vst.msk [vmem:[%s1134_s14] sm:$0xff] %vm538_vm11, %v537_v7 }
 0x26e   : > { %v543_v9 = vpop.xlane.xlu0 %542 }
 0x26f   : > { %v544_v10 = vadd.f32 %v543_v9, %v540_v8 }
 0x271   : > { %545 = vst.msk [vmem:[%s1149_s17] sm:$0xff] %vm538_vm11, %v544_v10 }
 0x272 PF: > { %s769_s10 = sshll.u32 %s973_s25, 1  ;;  %s569_s15 = sshll.u32 %s1153_s18, 4  ;;  %s570_s15 = int_to_ptr.vmem [resolvable:$true] %s569_s15 }
 0x273   : > { %s565_s12 = sadd.s32 %s969_s24, %s769_s10  ;;  %s547_s16 = scalar_lea.sflag [#allocation6], %s1118_s7 }
 0x274   : > { %s770_s9 = sshll.u32 %s565_s12, 2  ;;  %s907_s24 = scalar_lea.hbm %s1227_s4, 16 }
 0x275   : > { %s567_s23 = scalar_lea.hbm %s1227_s4, %s770_s9 }
 0x276   : > { %s571_s14 = sshll.u32 %s567_s23, 4  ;;  %s572_s14 = int_to_ptr.hbm [resolvable:$true] %s571_s14 }
 0x277   : > { %s901_s19 = sshra.s32 %s572_s14, 4  ;;  %s902_s19 = int_to_ptr.hbm [resolvable:$true] %s901_s19 }
 0x278   : > { %s903_s17 = scalar_lea.hbm %s902_s19, 4  ;;  %p908_p0 = scmp.lt.s32.totalorder %s902_s19, %s1227_s4 }
 0x279   : > { %p904_p10 = scmp.ne.s32.totalorder %s902_s19, %s903_s17  ;;  %p909_p1 = scmp.lt.s32.totalorder %s907_s24, %s903_s17 }
 0x27b   : > { %p905_p11 = pnand %p904_p10, %p1093_p9  ;;  %p910_p2 = por %p909_p1, %p908_p0 }
 0x27d   : > { %p906_p13 = pneg %p905_p11 }
 0x27f   : > { %p911_p4 = pnand %p910_p2, %p906_p13 }
 0x281   : > { %914 = shalt.err (!%p911_p4)
}
 0x282   : > { %775 = dma.vmem_to_hbm [thread:$0]  (%p1093_p9), %s570_s15, 64, %s572_s14, %s547_s16  }
 0x283 PF: > { %s1246_s7 = sld [smem:[#allocation10_spill]]  ;;  %p786_p3 = scmp.ge.s32.totalorder %s985_s28, 2 }
 0x285   : > { %p782_p5 = pnand %p786_p3, %p1099_p12 }
 0x287   : > { %p783_p6 = pneg %p782_p5 }
 0x289   : > { %s589_s30 = sand.u32 1, %s1246_s7  }
 0x28a   : > { %s590_s10 = scalar_lea.sflag [#allocation6], %s589_s30 }
 0x28b   : > { %952 = dma.done.wait (%p783_p6), %s590_s10, 64  }
 0x28c   : > { %954 = vsyncadd (%p783_p6), %s590_s10, 4294967232  ;;  %s23_s28 = sadd.s32 1, %s985_s28   ;;  %s1248_s12 = sld [smem:[#allocation11_spill]] }
 0x28d   : > { %p20_p7 = scmp.ge.s32.totalorder %s23_s28, 6   ;;  %s1249_s23 = sld [smem:[#allocation15_spill]] }
 0x28e   : > { %s1250_s13 = sld [smem:[#allocation12_spill]]  ;;  %s1252_s21 = smov %s961_s22 }
 0x28f   : > { %s1251_s15 = sld [smem:[#allocation13_spill]]  ;;  %s1254_s24 = smov %s977_s26 }
 0x290   : > { %s1255_s25 = smov %s981_s27 }
 0x291   :  { %22 = sbr.rel (!%p20_p7) target bundleno = 7 (0x7), region = 127 }
 0x292   : > { %s1253_s22 = smov %s1248_s12 }
 0x294   : > { %s1256_s26 = smov %s1250_s13 }
 0x295   : > { %s1257_s27 = smov %s1251_s15 }
 0x296   :  { %610 = vsyncpa [#allocation5], 1 }
 0x297   :  { %612 = vsyncpa [#allocation5 + $0x1], 1 }
 0x298   :  { %613 = vsyncpa [#allocation6], 1 }
 0x299   :  { %615 = vsyncpa [#allocation6 + $0x1], 1 }

</bundles_post_ra>
